<compile_context>
chip_gen: v6e
topology: v6e:2x2x1
jax: 0.10.0
libtpu: 0.0.40
codegen_flags: <defaults>
</compile_context>

<pallas_src>
import jax
import jax.numpy as jnp
from jax import lax
from jax.experimental import pallas as pl
from jax.experimental.pallas import tpu as pltpu

_TAP_DTYPE = jnp.bfloat16     # set to jnp.float32 for full-precision taps
_TARGET_TILE = 2048           # lanes per grid step (multiple of 128)
_LANES = 128


# ----------------------------- Pallas kernel ------------------------------- #
def _blend_kernel(g_ref, w_ref, o_ref):
    # g_ref: (C, 4, T) gathered source taps (tap axis on sublanes), bf16/f32.
    # w_ref: (4, T) f32 bilinear weights (affine fill, OOB and pad masks folded in).
    # o_ref: (C, T) f32 blended output.
    # Pure VPU multiplies + a size-4 sublane reduction; lane-dense stores.
    g = g_ref[...].astype(jnp.float32)
    w = w_ref[...]
    o_ref[...] = jnp.sum(g * w[None, :, :], axis=1)


def _choose_tile(hw, target=_TARGET_TILE, lanes=_LANES):
    """Lane-dense tile + padded pixel count; keep >= 2 grid steps when possible."""
    hw_l = -(-hw // lanes) * lanes            # round HW up to a multiple of 128
    tile = min(target, hw_l)
    if tile == hw_l and hw_l >= 2 * lanes:
        tile = (hw_l // 2 // lanes) * lanes   # split so v7x's 2 TCs both get work
    steps = -(-hw_l // tile)
    return tile, steps * tile                 # (tile, padded pixel count)


def warp_pallas(x_flat, tap_idx, tap_w, *, tap_dtype=_TAP_DTYPE):
    """Apply the 4-tap bilinear warp to all channels.

    x_flat:(C,HW) f32, tap_idx:(4,HW) int32 in [0,HW), tap_w:(4,HW) f32.
    """
    C, HW = x_flat.shape
    tile, HWp = _choose_tile(HW)
    pad = HWp - HW
    if pad:
        tap_idx = jnp.pad(tap_idx, ((0, 0), (0, pad)))   # pad index 0 (always valid)
        tap_w = jnp.pad(tap_w, ((0, 0), (0, pad)))       # pad weight 0 -> output 0

    # TODO(synk): the data-dependent per-pixel gather stays in XLA as one jnp.take
    # pass; Mosaic has no general in-kernel lane gather across an arbitrary-width
    # source, so only the bilinear blend hot path runs in Pallas.
    g = jnp.take(x_flat.astype(tap_dtype), tap_idx, axis=1, mode="clip")  # (C,4,HWp)

    grid = (HWp // tile,)
    g_spec = pl.BlockSpec((C, 4, tile), lambda i: (0, 0, i))
    w_spec = pl.BlockSpec((4, tile), lambda i: (0, i))
    o_spec = pl.BlockSpec((C, tile), lambda i: (0, i))

    g_bytes = C * 4 * HWp * jnp.dtype(tap_dtype).itemsize
    cost = pl.CostEstimate(
        flops=8 * C * HWp,
        transcendentals=0,
        bytes_accessed=g_bytes + 4 * HWp * 4 + C * HWp * 4,  # taps + weights + out
    )

    out = pl.pallas_call(
        _blend_kernel,
        out_shape=jax.ShapeDtypeStruct((C, HWp), jnp.float32),
        grid=grid,
        in_specs=[g_spec, w_spec],
        out_specs=o_spec,
        compiler_params=pltpu.CompilerParams(
            dimension_semantics=("parallel",),
            vmem_limit_bytes=32 * 1024 * 1024,
        ),
        cost_estimate=cost,
    )(g, tap_w)
    return out[:, :HW]


# ------------------------- plain-JAX parameter glue ------------------------ #
def _gaussian_blur(noise, sigma):
    # Separable Gaussian blur via small dense row/col matrices (O(H^2 W + H W^2)).
    # TODO(synk): torchvision uses reflect padding + kernel_size=int(8*sigma+1);
    # exact padding parity is not reproducible here (and torch RNG differs anyway).
    H, W = noise.shape

    def blur_mat(n):
        idx = jnp.arange(n, dtype=jnp.float32)
        d = idx[:, None] - idx[None, :]
        g = jnp.exp(-0.5 * (d / sigma) ** 2)
        return g / jnp.sum(g, axis=1, keepdims=True)

    return blur_mat(H) @ noise @ blur_mat(W).T


def build_warp_taps(key, H, W, alpha=5.0, sigma=10.0, degrees=45.0,
                    translate=(0.15, 0.15)):
    """O(HW) tap construction for ElasticTransform o RandomAffine (inverse warp).

    Returns (tap_idx:(4,HW) int32, tap_w:(4,HW) f32): 4 bilinear source taps +
    weights per output pixel; affine fill=0 and zero padding are folded into the
    weights.
    """
    k_dx, k_dy, k_ang, k_tx, k_ty = jax.random.split(key, 5)

    # Elastic displacement field (torchvision convention: normalized grid units).
    dx = _gaussian_blur(jax.random.uniform(k_dx, (H, W)) * 2.0 - 1.0, sigma) * alpha / W
    dy = _gaussian_blur(jax.random.uniform(k_dy, (H, W)) * 2.0 - 1.0, sigma) * alpha / H
    dx_pix = dx * W / 2.0  # normalized -> pixel units
    dy_pix = dy * H / 2.0

    # RandomAffine params: rotation in [-45, 45] deg, translation up to 15%.
    ang = jax.random.uniform(k_ang, (), minval=-degrees, maxval=degrees) * jnp.pi / 180.0
    tx = jnp.round(jax.random.uniform(k_tx, (), minval=-translate[0] * W, maxval=translate[0] * W))
    ty = jnp.round(jax.random.uniform(k_ty, (), minval=-translate[1] * H, maxval=translate[1] * H))

    ii, jj = jnp.meshgrid(jnp.arange(H, dtype=jnp.float32),
                          jnp.arange(W, dtype=jnp.float32), indexing="ij")
    cy, cx = (H - 1) / 2.0, (W - 1) / 2.0

    # Inverse affine (rotation about center + translation), NEAREST sampling
    # (torchvision RandomAffine default interpolation is NEAREST, fill=0).
    u = jj - tx - cx
    v = ii - ty - cy
    xa = jnp.cos(ang) * u + jnp.sin(ang) * v + cx
    ya = -jnp.sin(ang) * u + jnp.cos(ang) * v + cy
    rj = jnp.floor(xa + 0.5).astype(jnp.int32)   # floor(x+0.5), not round-half-even
    ri = jnp.floor(ya + 0.5).astype(jnp.int32)
    aff_in = (rj >= 0) & (rj < W) & (ri >= 0) & (ri < H)
    rj_c = jnp.clip(rj, 0, W - 1)
    ri_c = jnp.clip(ri, 0, H - 1)

    # Elastic bilinear sample coordinates at the affine-selected source pixel.
    xs = rj_c.astype(jnp.float32) + dx_pix[ri_c, rj_c]
    ys = ri_c.astype(jnp.float32) + dy_pix[ri_c, rj_c]

    x0 = jnp.floor(xs); y0 = jnp.floor(ys)
    x1 = x0 + 1.0;      y1 = y0 + 1.0
    wx1 = xs - x0; wx0 = 1.0 - wx1
    wy1 = ys - y0; wy0 = 1.0 - wy1

    out_valid = aff_in.astype(jnp.float32)  # fill=0 outside affine range
    idx_list, w_list = [], []
    for (yc, xc, wy, wx) in ((y0, x0, wy0, wx0), (y0, x1, wy0, wx1),
                             (y1, x0, wy1, wx0), (y1, x1, wy1, wx1)):
        xi = xc.astype(jnp.int32); yi = yc.astype(jnp.int32)
        inb = ((xi >= 0) & (xi < W) & (yi >= 0) & (yi < H)).astype(jnp.float32)
        w = (wy * wx * inb * out_valid).reshape(-1)
        idx = (jnp.clip(yi, 0, H - 1) * W + jnp.clip(xi, 0, W - 1)).reshape(-1)
        idx_list.append(idx)
        w_list.append(w)
    return jnp.stack(idx_list).astype(jnp.int32), jnp.stack(w_list).astype(jnp.float32)


def custom_transform_forward(key, img, mask, p=0.5):
    """Equivalent of CustomTransform.forward(img, mask)."""
    # cat = torch.cat([img, mask], dim=0)
    cat = jnp.concatenate([img, mask], axis=0).astype(jnp.float32)
    C, H, W = cat.shape
    k_apply, k_warp = jax.random.split(key)

    def warp_branch(cat_in):
        tap_idx, tap_w = build_warp_taps(k_warp, H, W)
        out = warp_pallas(cat_in.reshape(C, H * W), tap_idx, tap_w)
        return out.reshape(C, H, W)

    # if torch.rand(1).item() < self.p: apply the transform; else pass through
    # bit-exactly (lax.cond skips the warp work entirely on the false branch).
    apply = jax.random.uniform(k_apply, ()) < p
    out = lax.cond(apply, warp_branch, lambda c: c, cat)

    # return (cat[:-1, ...], cat[-1, ...])
    return out[:-1], out[-1]


if __name__ == "__main__":
    key = jax.random.PRNGKey(0)
    k_img, k_mask, k_t = jax.random.split(key, 3)
    img = jax.random.uniform(k_img, (4, 16, 16), dtype=jnp.float32)
    mask = (jax.random.uniform(k_mask, (1, 16, 16)) > 0.5).astype(jnp.float32)

    fwd = jax.jit(custom_transform_forward, static_argnames=("p",))

    # Force the warp path (p=1.0) so the Pallas kernel definitely executes.
    out_img, out_mask = fwd(k_t, img, mask, p=1.0)
    jax.block_until_ready((out_img, out_mask))
    assert out_img.shape == (4, 16, 16), out_img.shape
    assert out_mask.shape == (16, 16), out_mask.shape
    assert jnp.all(jnp.isfinite(out_img)) and jnp.all(jnp.isfinite(out_mask))

    # Skip path (p=0.0) must return the inputs bit-exactly.
    id_img, id_mask = fwd(k_t, img, mask, p=0.0)
    jax.block_until_ready((id_img, id_mask))
    assert jnp.array_equal(id_img, img)
    assert jnp.array_equal(id_mask, mask[0])

    # Spec-default call (p=0.5), branch chosen by the RNG as in the module.
    out_img2, out_mask2 = fwd(k_t, img, mask, p=0.5)
    jax.block_until_ready((out_img2, out_mask2))
    assert out_img2.shape == (4, 16, 16) and out_mask2.shape == (16, 16)

    print("KERNEL_OK")
</pallas_src>

<mosaic_0001>
module attributes {stable_mosaic.version = 11 : i64} {
  func.func @_blend_kernel(%arg0: i32, %arg1: memref<5x4x128xbf16, #tpu.memory_space<vmem>>, %arg2: memref<4x128xf32, #tpu.memory_space<vmem>>, %arg3: memref<5x128xf32, #tpu.memory_space<vmem>>) attributes {dimension_semantics = [#tpu.dimension_semantics<parallel>], iteration_bounds = array<i64: 2>, scalar_prefetch = 0 : i64, scratch_operands = 0 : i64, tpu.core_type = #tpu.core_type<tc>, window_params = [{transform_indices = @transform_0, window_bounds = array<i64: 5, 4, 128>}, {transform_indices = @transform_1, window_bounds = array<i64: 4, 128>}, {transform_indices = @transform_2, window_bounds = array<i64: 5, 128>}]} {
    %c0 = arith.constant 0 : index
    %c0_0 = arith.constant 0 : index
    %c0_1 = arith.constant 0 : index
    %0 = vector.load %arg1[%c0, %c0_0, %c0_1] : memref<5x4x128xbf16, #tpu.memory_space<vmem>>, vector<5x4x128xbf16>
    %1 = arith.extf %0 : vector<5x4x128xbf16> to vector<5x4x128xf32>
    %c0_2 = arith.constant 0 : index
    %c0_3 = arith.constant 0 : index
    %2 = vector.load %arg2[%c0_2, %c0_3] : memref<4x128xf32, #tpu.memory_space<vmem>>, vector<4x128xf32>
    %3 = vector.shape_cast %2 : vector<4x128xf32> to vector<1x4x128xf32>
    %4 = vector.broadcast %3 : vector<1x4x128xf32> to vector<5x4x128xf32>
    %5 = arith.mulf %1, %4 : vector<5x4x128xf32>
    %cst = arith.constant dense<0.000000e+00> : vector<5x128xf32>
    %6 = vector.multi_reduction <add>, %5, %cst [1] : vector<5x4x128xf32> to vector<5x128xf32>
    %c0_4 = arith.constant 0 : index
    %c0_5 = arith.constant 0 : index
    %7 = vector.load %arg3[%c0_4, %c0_5] : memref<5x128xf32, #tpu.memory_space<vmem>>, vector<5x128xf32>
    tpu.vector_store %arg3[%c0_4, %c0_5], %6 {strides = array<i32>} : memref<5x128xf32, #tpu.memory_space<vmem>>, vector<5x128xf32>,
    return
  }
  func.func @transform_0(%arg0: i32) -> (i32, i32, i32) {
    %c0_i32 = arith.constant 0 : i32
    %c0_i32_0 = arith.constant 0 : i32
    %c0_i32_1 = arith.constant 0 : i32
    return %c0_i32, %c0_i32_0, %arg0 : i32, i32, i32
  }
  func.func @transform_1(%arg0: i32) -> (i32, i32) {
    %c0_i32 = arith.constant 0 : i32
    %c0_i32_0 = arith.constant 0 : i32
    return %c0_i32, %arg0 : i32, i32
  }
  func.func @transform_2(%arg0: i32) -> (i32, i32) {
    %c0_i32 = arith.constant 0 : i32
    %c0_i32_0 = arith.constant 0 : i32
    return %c0_i32, %arg0 : i32, i32
  }
}

</mosaic_0001>

<bundles_post_ra>
// kernel: branch_1_fun.1
= control target key start
LH: loop header
LB: loop body
LE: loop exit
PB: predicated region body
PF: predicated region fallthrough
CT: control target
= control target key end

     0   :  { %s431_s9 = smov 0   ;;  %s433_s10 = smov 0   ;;  %s492_s0 = inlined_call_operand.vmem [shape: bf16[5,4,256], index: 0, kind: input, shape index: {}]   ;;  %s493_s1 = inlined_call_operand.vmem [shape: f32[4,256], index: 1, kind: input, shape index: {}]   ;;  %s494_s2 = inlined_call_operand.vmem [shape: f32[5,256], index: 2, kind: output, shape index: {}]  }
   0x1   :  { %s435_s11 = smov 0  }
   0x2 LB: > { %s356_s12 = sadd.s32 4294967295, %s414_s11   ;;  %s448_s13 = sadd.s32 1, %s414_s11   ;;  %s414_s11 = sphi %s435_s11, %s497_s11   ;;  %s410_s10 = sphi %s433_s10, %s496_s10   ;;  %s406_s9 = sphi %s431_s9, %s495_s9  }
   0x3   : > { %s16_s14 = ssub.s32 %s414_s11, %s448_s13  ;;  %s19_s15 = sadd.s32 1, %s410_s10 }
   0x4   : > { %p17_p0 = scmp.eq.s32.totalorder %s16_s14, 0  ;;  %p26_p1 = scmp.ne.s32.totalorder %s410_s10, %s406_s9 }
   0x5   : > { %p27_p2 = scmp.eq.s32.totalorder %s414_s11, 0  ;;  %p359_p4 = scmp.ge.s32.totalorder %s414_s11, 2 }
   0x6   : > { %s457_s16 = scalar_select %p17_p0, %s410_s10, %s19_s15  }
   0x7   : > { %p28_p3 = por %p27_p2, %p26_p1  ;;  %104 = sbr.rel (%p359_p4) target bundleno = 20 (0x14), region = 16 }
   0xc   : > { %107 = sbr.rel (!%p28_p3) target bundleno = 20 (0x14), region = 20  ;;  %s109_s17 = sand.u32 (%p28_p3), 1, %s410_s10  }
   0xd   : > { %s360_s18 = sshll.u32 (%p28_p3), %s414_s11, 1  ;;  %s366_s19 = smul.u32 (%p28_p3), 10, %s109_s17 }
   0xe   : > { %s113_s22 = scalar_lea.vmem (%p28_p3), %s492_s0, %s360_s18 }
   0xf   : > { %v130_v0 = vld [vmem:[%s113_s22] sm:$0x3] (%p28_p3)  ;;  %v132_v1 = vld [vmem:[%s113_s22 + $0x4] sm:$0x3] (%p28_p3)  ;;  %v134_v2 = vld [vmem:[%s113_s22 + $0x8] sm:$0x3] (%p28_p3) }
  0x10   : > { %v136_v3 = vld [vmem:[%s113_s22 + $0xc] sm:$0x3] (%p28_p3)  ;;  %v138_v4 = vld [vmem:[%s113_s22 + $0x10] sm:$0x3] (%p28_p3)  ;;  %s111_s23 = scalar_lea.vmem (%p28_p3), [#allocation2], %s366_s19 }
  0x11   : > { %131 = vst [vmem:[%s111_s23] sm:$0x3] %v130_v0  ;;  %133 = vst [vmem:[%s111_s23 + $0x2] sm:$0x3] %v132_v1 }
  0x12   : > { %135 = vst [vmem:[%s111_s23 + $0x4] sm:$0x3] %v134_v2  ;;  %137 = vst [vmem:[%s111_s23 + $0x6] sm:$0x3] %v136_v3 }
  0x13   : > { %139 = vst [vmem:[%s111_s23 + $0x8] sm:$0x3] %v138_v4 }
  0x14 PF: > { %p361_p5 = scmp.ge.s32.totalorder %s414_s11, 1  ;;  %p179_p6 = scmp.lt.s32.totalorder %s414_s11, 3 }
  0x16   : > { %p180_p7 = pnand %p361_p5, %p179_p6 }
  0x17   : > { %s186_s24 = sand.u32 (!%p180_p7), 1, %s406_s9   ;;  %p210_p8 = scmp.lt.s32.totalorder (!%p180_p7), %s356_s12, 1 }
  0x18   : > { %183 = sbr.rel (%p180_p7) target bundleno = 53 (0x35), region = 65 }
  0x19   : > { %s367_s25 = smul.u32 (!%p180_p7), 10, %s186_s24 }
  0x1b   : > { %s188_s27 = scalar_lea.vmem (!%p180_p7), [#allocation2], %s367_s25 }
  0x1d   : > { %s499_s12 = smov (!%p210_p8, %s356_s12), 1  ;;  %v218_v5 = vld [vmem:[%s188_s27] sm:$0x3]  ;;  %v219_v6 = vld [vmem:[%s188_s27 + $0x2] sm:$0x3]  ;;  %vm234_vm0 = vcmask 1043456  }
  0x1e   : > { %s362_s26 = sshll.u32 %s499_s12, 2  ;;  %v220_v7 = vld [vmem:[%s188_s27 + $0x4] sm:$0x3]  ;;  %v221_v8 = vld [vmem:[%s188_s27 + $0x6] sm:$0x3]  ;;  %v223_v10 = vunpack.c.l.bf16 %v218_v5  ;;  %v224_v11 = vunpack.c.l.bf16 %v219_v6  ;;  %vm275_vm1 = vcmask 1041409  }
  0x1f   : > { %s213_s30 = scalar_lea.vmem %s493_s1, %s362_s26  ;;  %v222_v9 = vld [vmem:[%s188_s27 + $0x8] sm:$0x3]  ;;  %v225_v12 = vunpack.c.l.bf16 %v220_v7  ;;  %v226_v13 = vunpack.c.l.bf16 %v221_v8  ;;  %s363_s3 = sshll.u32 %s499_s12, 3  ;;  %vm277_vm2 = vcmask 1042434   ;;  %vm279_vm3 = vcmask 1043459  }
  0x20   : > { %v227_v14 = vunpack.c.l.bf16 %v222_v9  ;;  %v228_v15 = vld [vmem:[%s213_s30] sm:$0xf]  ;;  %vm281_vm4 = vcmask 1044484   ;;  %s217_s6 = scalar_lea.vmem %s494_s2, %s363_s3 }
  0x21   : > { %v229_v16 = vmul.f32 %v228_v15, %v223_v10  ;;  %v230_v17 = vmul.f32 %v228_v15, %v224_v11  ;;  %v231_v18 = vmul.f32 %v228_v15, %v225_v12  ;;  %v232_v19 = vmul.f32 %v228_v15, %v226_v13 }
  0x22   : > { %v233_v20 = vmul.f32 %v228_v15, %v227_v14 }
  0x23   : > { %v235_v21 = vsel %vm234_vm0, %v229_v16, 0.0  ;;  %v242_v22 = vsel %vm234_vm0, %v230_v17, 0.0  ;;  %v249_v25 = vsel %vm234_vm0, %v231_v18, 0.0  ;;  %v256_v26 = vsel %vm234_vm0, %v232_v19, 0.0 }
  0x24   : > { %v236_v23 = vrot.slane %v235_v21, 4  ;;  %v243_v24 = vrot.slane %v242_v22, 4  ;;  %v250_v27 = vrot.slane %v249_v25, 4  ;;  %v257_v28 = vrot.slane %v256_v26, 4 }
  0x25   : > { %v263_v29 = vsel %vm234_vm0, %v233_v20, 0.0 }
  0x26   : > { %v237_v30 = vadd.f32 %v236_v23, %v235_v21  ;;  %v244_v31 = vadd.f32 %v243_v24, %v242_v22  ;;  %v264_v32 = vrot.slane %v263_v29, 4  ;;  %v251_v33 = vadd.f32 %v250_v27, %v249_v25 }
  0x27   : > { %v258_v34 = vadd.f32 %v257_v28, %v256_v26 }
  0x28   : > { %v238_v35 = vrot.slane %v237_v30, 2  ;;  %v245_v36 = vrot.slane %v244_v31, 2  ;;  %v265_v37 = vadd.f32 %v264_v32, %v263_v29  ;;  %v252_v38 = vrot.slane %v251_v33, 2 }
  0x29   : > { %v259_v39 = vrot.slane %v258_v34, 2 }
  0x2a   : > { %v239_v40 = vadd.f32 %v238_v35, %v237_v30  ;;  %v246_v41 = vadd.f32 %v245_v36, %v244_v31  ;;  %v266_v42 = vrot.slane %v265_v37, 2  ;;  %v253_v43 = vadd.f32 %v252_v38, %v251_v33 }
  0x2b   : > { %v260_v44 = vadd.f32 %v259_v39, %v258_v34 }
  0x2c   : > { %v240_v45 = vrot.slane %v239_v40, 1  ;;  %v247_v46 = vrot.slane %v246_v41, 1  ;;  %v267_v47 = vadd.f32 %v266_v42, %v265_v37  ;;  %v254_v48 = vrot.slane %v253_v43, 1 }
  0x2d   : > { %v261_v49 = vrot.slane %v260_v44, 1 }
  0x2e   : > { %v241_v50 = vadd.f32 %v240_v45, %v239_v40  ;;  %v248_v51 = vadd.f32 %v247_v46, %v246_v41  ;;  %v268_v52 = vrot.slane %v267_v47, 1  ;;  %v255_v53 = vadd.f32 %v254_v48, %v253_v43 }
  0x2f   : > { %v262_v54 = vadd.f32 %v261_v49, %v260_v44 }
  0x30   : > { %v269_v55 = vadd.f32 %v268_v52, %v267_v47  ;;  %v276_v56 = vsel %vm275_vm1, %v248_v51, %v241_v50 }
  0x31   : > { %v278_v57 = vsel %vm277_vm2, %v255_v53, %v276_v56 }
  0x32   : > { %v280_v58 = vsel %vm279_vm3, %v262_v54, %v278_v57 }
  0x33   : > { %v282_v59 = vsel %vm281_vm4, %v269_v55, %v280_v58 }
  0x34   : > { %284 = vst [vmem:[%s217_s6] sm:$0x1f] %v282_v59 }
  0x35 PF: > { %p9_p9 = scmp.ge.s32.totalorder %s448_s13, 4   ;;  %s495_s9 = smov %s410_s10 }
  0x36   : > { %s496_s10 = smov %s457_s16  ;;  %s497_s11 = smov %s448_s13 }
  0x37   :  { %11 = sbr.rel (!%p9_p9) target bundleno = 2 (0x2), region = 107 }

</bundles_post_ra>
